<compile_context>
chip_gen: v7x
topology: tpu7x:2x2x1
jax: 0.10.0
libtpu: 0.0.40
codegen_flags: <defaults>
</compile_context>

<pallas_src>
import jax
import jax.numpy as jnp
from jax.experimental import pallas as pl
from jax.experimental.pallas import tpu as pltpu


# ----------------------------------------------------------------------------
# Tiny-shape path: gridless, whole arrays resident in VMEM, VPU-only compute.
# ----------------------------------------------------------------------------
def _mm_small_kernel(lhs_ref, rhs_ref, out_ref):
    lhs = lhs_ref[...]          # (M, K)
    rhs = rhs_ref[...]          # (K, N)
    K = lhs.shape[1]
    # Rank-1 accumulation on the VALU; K is a small static constant (4), so a
    # static Python unroll is fine and keeps the MXU out of the critical path.
    acc = lhs[:, 0:1] * rhs[0:1, :]
    for k in range(1, K):
        acc = acc + lhs[:, k : k + 1] * rhs[k : k + 1, :]
    out_ref[...] = acc


def _mm_small(lhs: jax.Array, rhs: jax.Array) -> jax.Array:
    M, K = lhs.shape
    _, N = rhs.shape
    cost = pl.CostEstimate(
        flops=2 * M * N * K,
        bytes_accessed=4 * (M * K + K * N + M * N),
        transcendentals=0,
    )
    return pl.pallas_call(
        _mm_small_kernel,
        out_shape=jax.ShapeDtypeStruct((M, N), jnp.float32),
        in_specs=[
            pl.BlockSpec(memory_space=pltpu.MemorySpace.VMEM),
            pl.BlockSpec(memory_space=pltpu.MemorySpace.VMEM),
        ],
        out_specs=pl.BlockSpec(memory_space=pltpu.MemorySpace.VMEM),
        cost_estimate=cost,
    )(lhs, rhs)


# ----------------------------------------------------------------------------
# Generalized path: tiled K-reduction matmul (used when shapes are real-sized
# and tile-aligned). f32 VMEM accumulator, init/finalize via pl.when, M/N axes
# parallel (megacore on v7x), K axis arbitrary (reduction, last).
# ----------------------------------------------------------------------------
def _mm_tiled_kernel(lhs_ref, rhs_ref, out_ref, acc_ref):
    @pl.when(pl.program_id(2) == 0)
    def _():
        acc_ref[...] = jnp.zeros_like(acc_ref)

    acc_ref[...] += jnp.dot(
        lhs_ref[...], rhs_ref[...], preferred_element_type=jnp.float32
    )

    @pl.when(pl.program_id(2) == pl.num_programs(2) - 1)
    def _():
        out_ref[...] = acc_ref[...].astype(out_ref.dtype)


def _mm_tiled(lhs: jax.Array, rhs: jax.Array, tm: int, tn: int, tk: int) -> jax.Array:
    M, K = lhs.shape
    _, N = rhs.shape
    cost = pl.CostEstimate(
        flops=2 * M * N * K,
        bytes_accessed=4 * (M * K + K * N + M * N),
        transcendentals=0,
    )
    return pl.pallas_call(
        _mm_tiled_kernel,
        out_shape=jax.ShapeDtypeStruct((M, N), jnp.float32),
        grid_spec=pltpu.PrefetchScalarGridSpec(
            num_scalar_prefetch=0,
            grid=(M // tm, N // tn, K // tk),
            in_specs=[
                pl.BlockSpec((tm, tk), lambda i, j, k: (i, k)),
                pl.BlockSpec((tk, tn), lambda i, j, k: (k, j)),
            ],
            out_specs=pl.BlockSpec((tm, tn), lambda i, j, k: (i, j)),
            scratch_shapes=[pltpu.VMEM((tm, tn), jnp.float32)],
        ),
        compiler_params=pltpu.CompilerParams(
            dimension_semantics=("parallel", "parallel", "arbitrary"),
        ),
        cost_estimate=cost,
    )(lhs, rhs)


def mm(lhs: jax.Array, rhs: jax.Array) -> jax.Array:
    """torch.mm equivalent: (M, K) @ (K, N) -> (M, N), float32."""
    M, K = lhs.shape
    K2, N = rhs.shape
    assert K == K2, "inner dimensions must match"

    # Tile budget: 256x256 output tile, tk=512 f32 — fits the 32 MiB default
    # scoped VMEM on v7x (64 MiB physical) and is 128/256-aligned for v5e/v6e MXUs.
    tm, tn, tk = 256, 256, 512
    if (M % tm == 0) and (N % tn == 0) and (K % tk == 0):
        return _mm_tiled(lhs, rhs, tm, tn, tk)
    # Toy / unaligned shapes: gridless whole-array kernel (zero pipelining overhead).
    return _mm_small(lhs, rhs)


if __name__ == "__main__":
    key = jax.random.PRNGKey(0)
    k_lhs, k_rhs = jax.random.split(key)
    lhs = jax.random.normal(k_lhs, (3, 4), dtype=jnp.float32)
    rhs = jax.random.normal(k_rhs, (4, 5), dtype=jnp.float32)

    out = mm(lhs, rhs)
    jax.block_until_ready(out)

    ref = lhs @ rhs
    assert out.shape == (3, 5)
    assert jnp.allclose(out, ref, atol=1e-5, rtol=1e-5)

    print("KERNEL_OK")
</pallas_src>

<mosaic_0001>
module attributes {stable_mosaic.version = 11 : i64} {
  func.func @_mm_small_kernel(%arg0: memref<3x4xf32, #tpu.memory_space<vmem>>, %arg1: memref<4x5xf32, #tpu.memory_space<vmem>>, %arg2: memref<3x5xf32, #tpu.memory_space<vmem>>) attributes {dimension_semantics = [], scalar_prefetch = 0 : i64, scratch_operands = 0 : i64, tpu.core_type = #tpu.core_type<tc>} {
    %c0 = arith.constant 0 : index
    %c0_0 = arith.constant 0 : index
    %0 = vector.load %arg0[%c0, %c0_0] : memref<3x4xf32, #tpu.memory_space<vmem>>, vector<3x4xf32>
    %c0_1 = arith.constant 0 : index
    %c0_2 = arith.constant 0 : index
    %1 = vector.load %arg1[%c0_1, %c0_2] : memref<4x5xf32, #tpu.memory_space<vmem>>, vector<4x5xf32>
    %2 = vector.extract_strided_slice %0 {offsets = [0, 0], sizes = [3, 1], strides = [1, 1]} : vector<3x4xf32> to vector<3x1xf32>
    %3 = vector.extract_strided_slice %1 {offsets = [0, 0], sizes = [1, 5], strides = [1, 1]} : vector<4x5xf32> to vector<1x5xf32>
    %4 = vector.broadcast %2 : vector<3x1xf32> to vector<3x5xf32>
    %5 = vector.broadcast %3 : vector<1x5xf32> to vector<3x5xf32>
    %6 = arith.mulf %4, %5 : vector<3x5xf32>
    %7 = vector.extract_strided_slice %0 {offsets = [0, 1], sizes = [3, 1], strides = [1, 1]} : vector<3x4xf32> to vector<3x1xf32>
    %8 = vector.extract_strided_slice %1 {offsets = [1, 0], sizes = [1, 5], strides = [1, 1]} : vector<4x5xf32> to vector<1x5xf32>
    %9 = vector.broadcast %7 : vector<3x1xf32> to vector<3x5xf32>
    %10 = vector.broadcast %8 : vector<1x5xf32> to vector<3x5xf32>
    %11 = arith.mulf %9, %10 : vector<3x5xf32>
    %12 = arith.addf %6, %11 : vector<3x5xf32>
    %13 = vector.extract_strided_slice %0 {offsets = [0, 2], sizes = [3, 1], strides = [1, 1]} : vector<3x4xf32> to vector<3x1xf32>
    %14 = vector.extract_strided_slice %1 {offsets = [2, 0], sizes = [1, 5], strides = [1, 1]} : vector<4x5xf32> to vector<1x5xf32>
    %15 = vector.broadcast %13 : vector<3x1xf32> to vector<3x5xf32>
    %16 = vector.broadcast %14 : vector<1x5xf32> to vector<3x5xf32>
    %17 = arith.mulf %15, %16 : vector<3x5xf32>
    %18 = arith.addf %12, %17 : vector<3x5xf32>
    %19 = vector.extract_strided_slice %0 {offsets = [0, 3], sizes = [3, 1], strides = [1, 1]} : vector<3x4xf32> to vector<3x1xf32>
    %20 = vector.extract_strided_slice %1 {offsets = [3, 0], sizes = [1, 5], strides = [1, 1]} : vector<4x5xf32> to vector<1x5xf32>
    %21 = vector.broadcast %19 : vector<3x1xf32> to vector<3x5xf32>
    %22 = vector.broadcast %20 : vector<1x5xf32> to vector<3x5xf32>
    %23 = arith.mulf %21, %22 : vector<3x5xf32>
    %24 = arith.addf %18, %23 : vector<3x5xf32>
    %c0_3 = arith.constant 0 : index
    %c0_4 = arith.constant 0 : index
    %25 = vector.load %arg2[%c0_3, %c0_4] : memref<3x5xf32, #tpu.memory_space<vmem>>, vector<3x5xf32>
    tpu.vector_store %arg2[%c0_3, %c0_4], %24 {strides = array<i32>} : memref<3x5xf32, #tpu.memory_space<vmem>>, vector<3x5xf32>,
    return
  }
}

</mosaic_0001>

<bundles_post_ra>
// kernel: tpu_custom_call.1
= control target key start
LH: loop header
LB: loop body
LE: loop exit
PB: predicated region body
PF: predicated region fallthrough
CT: control target
= control target key end

     0   :  { %7 = vsyncpa [#allocation3], 0  ;;  %s238_s0 = inlined_call_operand.hbm [shape: f32[3,4], index: 0, kind: input, shape index: {}]   ;;  %s239_s1 = inlined_call_operand.hbm [shape: f32[4,5], index: 1, kind: input, shape index: {}]   ;;  %s240_s2 = inlined_call_operand.hbm [shape: f32[3,5], index: 2, kind: output, shape index: {}]  }
   0x1   :  { %8 = vsyncpa [#allocation6], 0 }
   0x2   :  { %9 = vsyncpa [#allocation4], 0  ;;  %s180_s9 = smov [#allocation2]   ;;  %s181_s11 = smov [#allocation5]  }
   0x3   :  { %s16_s10 = sshll.u32 %s180_s9, 4  ;;  %s26_s12 = sshll.u32 %s181_s11, 4  ;;  %s17_s10 = int_to_ptr.vmem [resolvable:$true] %s16_s10  ;;  %s27_s12 = int_to_ptr.vmem [resolvable:$true] %s26_s12 }
   0x4   :  { %s108_s15 = scalar_lea.hbm %s238_s0, 64 }
   0x5   :  { %p109_p0 = scmp.ne.s32.totalorder %s238_s0, %s108_s15  ;;  %p112_p1 = scmp.lt.u32.totalorder %s108_s15, %s238_s0 }
   0x7   :  { %p114_p2 = pnand %p112_p1, %p109_p0 }
   0x9   :  { %117 = shalt.err (!%p114_p2)
}
   0xa   :  { %s118_s20 = scalar_lea.vmem %s17_s10, 64  ;;  %p123_p4 = scmp.lt.s32.totalorder %s17_s10, %s17_s10 }
   0xb   :  { %p119_p3 = scmp.ne.s32.totalorder %s17_s10, %s118_s20  ;;  %p124_p5 = scmp.lt.s32.totalorder %s118_s20, %s118_s20 }
   0xd   :  { %p125_p6 = por %p124_p5, %p123_p4 }
   0xf   :  { %p126_p7 = pnand %p125_p6, %p119_p3 }
  0x11   :  { %129 = shalt.err (!%p126_p7)
}
  0x12   :  { %19 = dma.hbm_to_vmem [thread:$0]  %s238_s0, 64, %s17_s10, [#allocation3]  }
  0x13   :  { %s130_s25 = scalar_lea.hbm %s239_s1, 64 }
  0x14   :  { %p131_p8 = scmp.ne.s32.totalorder %s239_s1, %s130_s25  ;;  %p134_p9 = scmp.lt.u32.totalorder %s130_s25, %s239_s1 }
  0x16   :  { %p136_p10 = pnand %p134_p9, %p131_p8 }
  0x18   :  { %139 = shalt.err (!%p136_p10)
}
  0x19   :  { %s140_s30 = scalar_lea.vmem %s27_s12, 64  ;;  %p145_p12 = scmp.lt.s32.totalorder %s27_s12, %s27_s12 }
  0x1a   :  { %p141_p11 = scmp.ne.s32.totalorder %s27_s12, %s140_s30  ;;  %p146_p13 = scmp.lt.s32.totalorder %s140_s30, %s140_s30 }
  0x1c   :  { %p147_p0 = por %p146_p13, %p145_p12 }
  0x1e   :  { %p148_p1 = pnand %p147_p0, %p141_p11 }
  0x20   :  { %151 = shalt.err (!%p148_p1)
}
  0x21   :  { %29 = dma.hbm_to_vmem [thread:$0]  %s239_s1, 64, %s27_s12, [#allocation6]  }
  0x22   :  { %174 = dma.done.wait [#allocation3], 64  }
  0x23   :  { %175 = vsyncadd [#allocation3], 4294967232 }
  0x24   :  { %176 = dma.done.wait [#allocation6], 64  }
  0x25   :  { %177 = vsyncadd [#allocation6], 4294967232  ;;  %v182_v0 = vmov 0   ;;  %v183_v1 = vmov 2   ;;  %v36_v2 = vld [vmem:[#allocation2] sm:$0x7]  ;;  %v43_v5 = vlaneseq }
  0x26   :  { %103 = vset.pattern.permute.xlu0 %v182_v0  ;;  %105 = vset.pattern.permute.xlu1 %v183_v1  ;;  %v184_v3 = vmov 1   ;;  %v185_v4 = vmov 3   ;;  %v37_v9 = vld [vmem:[#allocation5] sm:$0xf]  ;;  %s186_s1 = smov [#allocation7]   ;;  %vm78_vm0 = vcmask 34816  }
  0x27   :  { %40 = vperm.xlu0 %103, %v36_v2   ;;  %59 = vperm.xlu1 %105, %v36_v2   ;;  %v44_v6 = vshrl.u32 %v43_v5, 7  ;;  %s86_s4 = sshll.u32 %s186_s1, 4  ;;  %s87_s4 = int_to_ptr.vmem [resolvable:$true] %s86_s4 }
  0x28   :  { %s152_s5 = scalar_lea.vmem %s87_s4, 64  ;;  %p157_p3 = scmp.lt.s32.totalorder %s87_s4, %s87_s4 }
  0x29   :  { %v45_v7 = vsub.s32 0, %v44_v6  ;;  %v54_v8 = vsub.s32 1, %v44_v6  ;;  %v64_v11 = vsub.s32 2, %v44_v6  ;;  %v74_v13 = vsub.s32 3, %v44_v6  ;;  %p153_p2 = scmp.ne.s32.totalorder %s87_s4, %s152_s5  ;;  %p158_p4 = scmp.lt.s32.totalorder %s152_s5, %s152_s5 }
  0x2b   :  { %104 = vset.pattern.permute.xlu0 %v184_v3  ;;  %106 = vset.pattern.permute.xlu1 %v185_v4  ;;  %v46_v14 = vrot.slane %v37_v9, %v45_v7  ;;  %v55_v15 = vrot.slane %v37_v9, %v54_v8  ;;  %v65_v16 = vrot.slane %v37_v9, %v64_v11  ;;  %p159_p5 = por %p158_p4, %p157_p3 }
  0x2c   :  { %49 = vperm.xlu0 %104, %v36_v2   ;;  %69 = vperm.xlu1 %106, %v36_v2   ;;  %v75_v17 = vrot.slane %v37_v9, %v74_v13 }
  0x2d   :  { %p160_p6 = pnand %p159_p5, %p153_p2 }
  0x30   :  { %107 = vset.pattern.permute.xlu0 %v185_v4 }
  0xa6   :  { %v41_v10 = vpop.permute.xlu0 %40  ;;  %v60_v12 = vpop.permute.xlu1 %59 }
  0xa7   :  { %v47_v20 = vmul.f32 %v46_v14, %v41_v10  ;;  %v66_v22 = vmul.f32 %v65_v16, %v60_v12 }
  0xab   :  { %v50_v18 = vpop.permute.xlu0 %49  ;;  %v70_v19 = vpop.permute.xlu1 %69 }
  0xac   :  { %v56_v21 = vmul.f32 %v55_v15, %v50_v18  ;;  %v76_v24 = vmul.f32 %v75_v17, %v70_v19 }
  0xae   :  { %v57_v23 = vadd.f32 %v56_v21, %v47_v20 }
  0xb0   :  { %v67_v25 = vadd.f32 %v66_v22, %v57_v23 }
  0xb2   :  { %v77_v26 = vadd.f32 %v76_v24, %v67_v25 }
  0xb4   :  { %79 = vst.msk [vmem:[#allocation7] sm:$0x7] %vm78_vm0, %v77_v26 }
  0xb5   :  { %163 = shalt.err (!%p160_p6)
}
  0xb6   :  { %s164_s8 = scalar_lea.hbm %s240_s2, 64 }
  0xb7   :  { %p165_p7 = scmp.ne.s32.totalorder %s240_s2, %s164_s8  ;;  %p168_p8 = scmp.lt.u32.totalorder %s164_s8, %s240_s2 }
  0xb9   :  { %p170_p9 = pnand %p168_p8, %p165_p7 }
  0xbb   :  { %173 = shalt.err (!%p170_p9)
}
  0xbc   :  { %89 = dma.vmem_to_hbm [thread:$0]  %s87_s4, 64, %s240_s2, [#allocation4]  }
  0xbd   :  { %178 = dma.done.wait [#allocation4], 64  }
  0xbe   :  { %179 = vsyncadd [#allocation4], 4294967232 }
  0xbf   :  { %93 = vsyncpa [#allocation3], 1 }
  0xc0   :  { %94 = vsyncpa [#allocation6], 1 }
  0xc1   :  { %95 = vsyncpa [#allocation4], 1 }

</bundles_post_ra>
